<compile_context>
chip_gen: v7x
topology: tpu7x:2x2x1
jax: 0.10.0
libtpu: 0.0.40
codegen_flags: <defaults>
</compile_context>

<pallas_src>
import jax
import jax.numpy as jnp
from jax.experimental import pallas as pl
from jax.experimental.pallas import tpu as pltpu


def _res_gcn_d_last_kernel(x_ref, w_ref, b_ref, o_ref):
    # x_ref: (B, C_in, TN)   w_ref: (C_in, C_out)   b_ref: (1, C_out)   o_ref: (B, TN, C_out)
    B, C_in, TN = x_ref.shape

    x = x_ref[...]                                            # native (B, C_in, TN) tile
    # leaky_relu, negative_slope=0.01 (PyTorch default), fused on the VMEM tile.
    x = jnp.where(x > 0, x, x * jnp.float32(0.01))

    # Move C_in to the minor dim (XLU transpose, hidden under DMA) and fold B into the
    # matmul M dimension:  (B, C_in, TN) -> (B, TN, C_in) -> (B*TN, C_in).
    xm = jnp.transpose(x, (0, 2, 1)).reshape(B * TN, C_in)

    # 1x1 conv == single (B*TN, C_in) @ (C_in, C_out) MXU matmul, f32 accumulation.
    y = jnp.dot(xm, w_ref[...], preferred_element_type=jnp.float32)
    y = y + b_ref[...]                                        # bias broadcast over rows

    # Split B back out of M (leading-dim split only; minor dim unchanged) and store
    # directly in the PyTorch output layout.
    o_ref[...] = y.reshape(o_ref.shape).astype(o_ref.dtype)


def _pick_tile_n(N, B, C_in, C_out, dtype_bytes=4):
    """Largest N-tile that fits a double-buffered in/out pipeline in scoped VMEM."""
    def vmem_bytes(tn):
        x_tile = B * C_in * tn * dtype_bytes
        o_tile = B * tn * C_out * dtype_bytes
        return 2 * (x_tile + o_tile)          # double-buffered input + output tiles

    budget = 24 * 1024 * 1024                 # headroom under the 32 MiB scoped limit (v7x-safe)
    if vmem_bytes(N) <= budget:
        return N                              # whole-N block -> single grid step at small N
    tn = 2048                                 # large, 128-aligned tiles amortize per-step overhead
    while tn > 128 and vmem_bytes(tn) > budget:
        tn //= 2
    return tn


def res_gcn_d_last_forward(points, weight, bias, *, tile_n=None):
    """points: (B, C_in, N) f32; weight: (C_out, C_in); bias: (C_out,) -> (B, N, C_out)."""
    B, C_in, N = points.shape
    C_out = weight.shape[0]

    # Only the tiny parameters get re-laid-out host side; activations stay in native layout.
    w = jnp.transpose(weight, (1, 0))         # (C_in, C_out)
    b = bias.reshape(1, C_out)                # (1, C_out)

    if tile_n is None:
        tile_n = _pick_tile_n(N, B, C_in, C_out)
    grid_n = pl.cdiv(N, tile_n)

    out = pl.pallas_call(
        _res_gcn_d_last_kernel,
        out_shape=jax.ShapeDtypeStruct((B, N, C_out), points.dtype),
        grid=(grid_n,),
        in_specs=[
            pl.BlockSpec((B, C_in, tile_n), lambda j: (0, 0, j)),   # activations, native layout
            pl.BlockSpec((C_in, C_out), lambda j: (0, 0)),          # weight: resident in VMEM
            pl.BlockSpec((1, C_out), lambda j: (0, 0)),             # bias: resident in VMEM
        ],
        out_specs=pl.BlockSpec((B, tile_n, C_out), lambda j: (0, j, 0)),
        compiler_params=pltpu.CompilerParams(
            dimension_semantics=("parallel",),                      # N-tiles split across TCs on v7x
        ),
    )(points, w, b)
    return out


def reference_forward(points, weight, bias):
    # Pure-JAX reference mirroring the PyTorch module.
    x = jnp.where(points > 0, points, 0.01 * points)                 # (B, C_in, N)
    y = jnp.einsum("oc,bcn->bon", weight, x) + bias[None, :, None]   # (B, C_out, N)
    return jnp.transpose(y, (0, 2, 1))                               # (B, N, C_out)


if __name__ == "__main__":
    # Module config: in_channel=64, n_cout=32.  Small input: B=2, N=128.
    B, C_in, N, C_out = 2, 64, 128, 32

    key = jax.random.PRNGKey(0)
    k_pts, k_w, k_b = jax.random.split(key, 3)

    points = jax.random.normal(k_pts, (B, C_in, N), dtype=jnp.float32)

    # Deterministic parameter init (uniform, roughly PyTorch's Conv2d default scale).
    bound = 1.0 / (C_in ** 0.5)
    weight = jax.random.uniform(k_w, (C_out, C_in), jnp.float32, -bound, bound)
    bias = jax.random.uniform(k_b, (C_out,), jnp.float32, -bound, bound)

    out = res_gcn_d_last_forward(points, weight, bias)
    out = jax.block_until_ready(out)

    ref = reference_forward(points, weight, bias)
    assert out.shape == (B, N, C_out), out.shape
    assert jnp.allclose(out, ref, atol=1e-5, rtol=1e-5), "mismatch vs reference"

    print("KERNEL_OK")
</pallas_src>

<mosaic_0001>
module attributes {stable_mosaic.version = 11 : i64} {
  func.func @_res_gcn_d_last_kernel(%arg0: i32, %arg1: memref<2x64x128xf32, #tpu.memory_space<vmem>>, %arg2: memref<64x32xf32, #tpu.memory_space<vmem>>, %arg3: memref<1x32xf32, #tpu.memory_space<vmem>>, %arg4: memref<2x128x32xf32, #tpu.memory_space<vmem>>) attributes {dimension_semantics = [#tpu.dimension_semantics<parallel>], iteration_bounds = array<i64: 1>, scalar_prefetch = 0 : i64, scratch_operands = 0 : i64, tpu.core_type = #tpu.core_type<tc>, window_params = [{transform_indices = @transform_0, window_bounds = array<i64: 2, 64, 128>}, {pipeline_mode = #tpu.pipeline_mode<synchronous>, transform_indices = @transform_1, window_bounds = array<i64: 64, 32>}, {pipeline_mode = #tpu.pipeline_mode<synchronous>, transform_indices = @transform_2, window_bounds = array<i64: 1, 32>}, {transform_indices = @transform_3, window_bounds = array<i64: 2, 128, 32>}]} {
    %c0 = arith.constant 0 : index
    %c0_0 = arith.constant 0 : index
    %c0_1 = arith.constant 0 : index
    %0 = vector.load %arg1[%c0, %c0_0, %c0_1] : memref<2x64x128xf32, #tpu.memory_space<vmem>>, vector<2x64x128xf32>
    %cst = arith.constant 0.000000e+00 : f32
    %1 = vector.broadcast %cst : f32 to vector<2x64x128xf32>
    %2 = arith.cmpf ogt, %0, %1 : vector<2x64x128xf32>
    %cst_2 = arith.constant 0.00999999977 : f32
    %3 = vector.broadcast %cst_2 : f32 to vector<2x64x128xf32>
    %4 = arith.mulf %0, %3 : vector<2x64x128xf32>
    %5 = arith.select %2, %0, %4 : vector<2x64x128xi1>, vector<2x64x128xf32>
    %6 = tpu.transpose %5, [0, 2, 1] : vector<2x64x128xf32> -> vector<2x128x64xf32>
    %7 = vector.shape_cast %6 : vector<2x128x64xf32> to vector<256x64xf32>
    %c0_3 = arith.constant 0 : index
    %c0_4 = arith.constant 0 : index
    %8 = vector.load %arg2[%c0_3, %c0_4] : memref<64x32xf32, #tpu.memory_space<vmem>>, vector<64x32xf32>
    %cst_5 = arith.constant dense<0.000000e+00> : vector<256x32xf32>
    %9 = tpu.matmul %7, %8, %cst_5 {dimension_numbers = #tpu.dot_dimension_numbers<[1], [0], [0], [1], [0, 0, 1, 1], [], []>} : vector<256x64xf32>, vector<64x32xf32>, vector<256x32xf32> -> vector<256x32xf32>
    %c0_6 = arith.constant 0 : index
    %c0_7 = arith.constant 0 : index
    %10 = vector.load %arg3[%c0_6, %c0_7] : memref<1x32xf32, #tpu.memory_space<vmem>>, vector<1x32xf32>
    %11 = vector.broadcast %10 : vector<1x32xf32> to vector<256x32xf32>
    %12 = arith.addf %9, %11 : vector<256x32xf32>
    %13 = vector.shape_cast %12 : vector<256x32xf32> to vector<2x128x32xf32>
    %c0_8 = arith.constant 0 : index
    %c0_9 = arith.constant 0 : index
    %c0_10 = arith.constant 0 : index
    %14 = vector.load %arg4[%c0_8, %c0_9, %c0_10] : memref<2x128x32xf32, #tpu.memory_space<vmem>>, vector<2x128x32xf32>
    tpu.vector_store %arg4[%c0_8, %c0_9, %c0_10], %13 {strides = array<i32>} : memref<2x128x32xf32, #tpu.memory_space<vmem>>, vector<2x128x32xf32>,
    return
  }
  func.func @transform_0(%arg0: i32) -> (i32, i32, i32) {
    %c0_i32 = arith.constant 0 : i32
    %c0_i32_0 = arith.constant 0 : i32
    %c0_i32_1 = arith.constant 0 : i32
    return %c0_i32, %c0_i32_0, %arg0 : i32, i32, i32
  }
  func.func @transform_1(%arg0: i32) -> (i32, i32) {
    %c0_i32 = arith.constant 0 : i32
    %c0_i32_0 = arith.constant 0 : i32
    %c0_i32_1 = arith.constant 0 : i32
    return %c0_i32, %c0_i32_0 : i32, i32
  }
  func.func @transform_2(%arg0: i32) -> (i32, i32) {
    %c0_i32 = arith.constant 0 : i32
    %c0_i32_0 = arith.constant 0 : i32
    %c0_i32_1 = arith.constant 0 : i32
    return %c0_i32, %c0_i32_0 : i32, i32
  }
  func.func @transform_3(%arg0: i32) -> (i32, i32, i32) {
    %c0_i32 = arith.constant 0 : i32
    %c0_i32_0 = arith.constant 0 : i32
    %c0_i32_1 = arith.constant 0 : i32
    return %c0_i32, %arg0, %c0_i32_0 : i32, i32, i32
  }
}

</mosaic_0001>

<bundles_post_ra>
// kernel: tpu_custom_call.1
= control target key start
LH: loop header
LB: loop body
LE: loop exit
PB: predicated region body
PF: predicated region fallthrough
CT: control target
= control target key end

     0   :  { %8 = vsyncpa [#allocation3], 0  ;;  %s720_s12 = smov [#allocation2]   ;;  %s977_s0 = inlined_call_operand.hbm [shape: f32[2,64,128], index: 0, kind: input, shape index: {}]   ;;  %s978_s1 = inlined_call_operand.vmem [shape: f32[64,32], index: 1, kind: input, shape index: {}]   ;;  %s979_s2 = inlined_call_operand.vmem [shape: f32[1,32], index: 2, kind: input, shape index: {}]   ;;  %s980_s3 = inlined_call_operand.vmem [shape: f32[2,128,32], index: 3, kind: output, shape index: {}]  }
   0x1   :  { %s14_s13 = sshll.u32 %s720_s12, 4  ;;  %s696_s16 = scalar_lea.hbm %s977_s0, 2048  ;;  %s15_s13 = int_to_ptr.vmem [resolvable:$true] %s14_s13 }
   0x2   :  { %p697_p0 = scmp.ne.s32.totalorder %s977_s0, %s696_s16  ;;  %p700_p1 = scmp.lt.u32.totalorder %s696_s16, %s977_s0 }
   0x4   :  { %p702_p2 = pnand %p700_p1, %p697_p0 }
   0x6   :  { %705 = shalt.err (!%p702_p2)
}
   0x7   :  { %s706_s21 = scalar_lea.vmem %s15_s13, 2048  ;;  %p711_p4 = scmp.lt.s32.totalorder %s15_s13, %s15_s13 }
   0x8   :  { %p707_p3 = scmp.ne.s32.totalorder %s15_s13, %s706_s21  ;;  %p712_p5 = scmp.lt.s32.totalorder %s706_s21, %s706_s21 }
   0xa   :  { %p713_p6 = por %p712_p5, %p711_p4 }
   0xc   :  { %p714_p7 = pnand %p713_p6, %p707_p3 }
   0xe   :  { %717 = shalt.err (!%p714_p7)
}
   0xf   :  { %s721_s22 = smov 128   ;;  %s722_s23 = smov 8  }
  0x10   :  { %20 = dma.hbm_to_vmem [thread:$0]  %s977_s0, 2048, %s15_s13, [#allocation3], %s721_s22, %s721_s22, %s722_s23  }
  0x11   :  { %718 = dma.done.wait [#allocation3], 2048  }
  0x12   :  { %719 = vsyncadd [#allocation3], 4294965248  ;;  %v36_v0 = vld [vmem:[#allocation2 + $0x40] sm:$0xff]  ;;  %v37_v2 = vld [vmem:[#allocation2 + $0x48] sm:$0xff] }
  0x13   :  { %v28_v1 = vld [vmem:[#allocation2] sm:$0xff]  ;;  %vm52_vm0 = vcmp.gt.f32.partialorder %v36_v0, 0.0  ;;  %v68_v3 = vmul.f32 0.01, %v36_v0  ;;  %vm53_vm2 = vcmp.gt.f32.partialorder %v37_v2, 0.0  ;;  %v29_v6 = vld [vmem:[#allocation2 + $0x8] sm:$0xff] }
  0x14   :  { %vm44_vm1 = vcmp.gt.f32.partialorder %v28_v1, 0.0  ;;  %v60_v4 = vmul.f32 0.01, %v28_v1  ;;  %v69_v5 = vmul.f32 0.01, %v37_v2  ;;  %v38_v7 = vld [vmem:[#allocation2 + $0x50] sm:$0xff] }
  0x15   :  { %v30_v8 = vld [vmem:[#allocation2 + $0x10] sm:$0xff]  ;;  %v84_v9 = vsel %vm52_vm0, %v36_v0, %v68_v3  ;;  %vm45_vm3 = vcmp.gt.f32.partialorder %v29_v6, 0.0  ;;  %v61_v11 = vmul.f32 0.01, %v29_v6  ;;  %v70_v14 = vmul.f32 0.01, %v38_v7 }
  0x16   :  { %v76_v10 = vsel %vm44_vm1, %v28_v1, %v60_v4  ;;  %124 = vxpose.xlu1.b32.start [1/8] (short) %v84_v9, 128  ;;  %v85_v12 = vsel %vm53_vm2, %v37_v2, %v69_v5  ;;  %v62_v15 = vmul.f32 0.01, %v30_v8  ;;  %v39_v16 = vld [vmem:[#allocation2 + $0x58] sm:$0xff]  ;;  %vm54_vm4 = vcmp.gt.f32.partialorder %v38_v7, 0.0  ;;  %v40_v22 = vld [vmem:[#allocation2 + $0x60] sm:$0xff]  ;;  %v157_v24 = vld [vmem:[%s978_s1 + $0x8] sm:$0xff] }
  0x17   :  { %92 = vxpose.xlu0.b32.start [1/8] (short) %v76_v10, 128  ;;  %v77_v13 = vsel %vm45_vm3, %v29_v6, %v61_v11  ;;  %vm46_vm5 = vcmp.gt.f32.partialorder %v30_v8, 0.0  ;;  %v31_v17 = vld [vmem:[#allocation2 + $0x18] sm:$0xff]  ;;  %v71_v18 = vmul.f32 0.01, %v39_v16  ;;  %v86_v19 = vsel %vm54_vm4, %v38_v7, %v70_v14  ;;  %v156_v23 = vld [vmem:[%s978_s1] sm:$0xff]  ;;  %v158_v26 = vld [vmem:[%s978_s1 + $0x10] sm:$0xff] }
  0x18   :  { %v78_v20 = vsel %vm46_vm5, %v30_v8, %v62_v15  ;;  %vm55_vm6 = vcmp.gt.f32.partialorder %v39_v16, 0.0  ;;  %v63_v21 = vmul.f32 0.01, %v31_v17  ;;  %vm47_vm7 = vcmp.gt.f32.partialorder %v31_v17, 0.0  ;;  %v32_v25 = vld [vmem:[#allocation2 + $0x20] sm:$0xff]  ;;  %v159_v27 = vld [vmem:[%s978_s1 + $0x18] sm:$0xff] }
  0x19   :  { %v87_v28 = vsel %vm55_vm6, %v39_v16, %v71_v18  ;;  %v668_v29 = vpack.c.bf16 %v157_v24, %v156_v23  ;;  %v72_v31 = vmul.f32 0.01, %v40_v22  ;;  %v64_v32 = vmul.f32 0.01, %v32_v25  ;;  %v41_v33 = vld [vmem:[#allocation2 + $0x68] sm:$0xff]  ;;  %v160_v36 = vld [vmem:[%s978_s1 + $0x20] sm:$0xff] }
  0x1a   :  { %125 = vxpose.xlu1.b32.cont [2/8] (short) %v85_v12, 128  ;;  %v79_v30 = vsel %vm47_vm7, %v31_v17, %v63_v21  ;;  %v672_v34 = vpack.c.bf16 %v159_v27, %v158_v26  ;;  %vm56_vm8 = vcmp.gt.f32.partialorder %v40_v22, 0.0  ;;  %vm48_vm9 = vcmp.gt.f32.partialorder %v32_v25, 0.0  ;;  %v33_v35 = vld [vmem:[#allocation2 + $0x28] sm:$0xff]  ;;  %v42_v42 = vld [vmem:[#allocation2 + $0x70] sm:$0xff]  ;;  %v163_v46 = vld [vmem:[%s978_s1 + $0x38] sm:$0xff] }
  0x1b   :  { %93 = vxpose.xlu0.b32.cont [2/8] (short) %v77_v13, 128  ;;  %669 = vmatprep.subr.bf16.mxu0 %v668_v29  ;;  %v161_v37 = vld [vmem:[%s978_s1 + $0x28] sm:$0xff]  ;;  %vm57_vm10 = vcmp.gt.f32.partialorder %v41_v33, 0.0  ;;  %v73_v38 = vmul.f32 0.01, %v41_v33  ;;  %v88_v39 = vsel %vm56_vm8, %v40_v22, %v72_v31  ;;  %v80_v40 = vsel %vm48_vm9, %v32_v25, %v64_v32  ;;  %v34_v44 = vld [vmem:[#allocation2 + $0x30] sm:$0xff]  ;;  %v43_v52 = vld [vmem:[#allocation2 + $0x78] sm:$0xff] }
  0x1c   :  { %684 = vmatprep.subr.bf16.mxu1 %v668_v29  ;;  %671 = vmatpush3.bf16.msra.mxu0 %v668_v29  ;;  %v65_v41 = vmul.f32 0.01, %v33_v35  ;;  %v676_v43 = vpack.c.bf16 %v161_v37, %v160_v36  ;;  %vm49_vm11 = vcmp.gt.f32.partialorder %v33_v35, 0.0  ;;  %v162_v45 = vld [vmem:[%s978_s1 + $0x30] sm:$0xff]  ;;  %v74_v49 = vmul.f32 0.01, %v42_v42 }
  0x1d   :  { %688 = vmatpush3.bf16.msra.mxu1 %v668_v29  ;;  %673 = vmatprep.subr.bf16.mxu0 %v672_v34  ;;  %v89_v47 = vsel %vm57_vm10, %v41_v33, %v73_v38  ;;  %v66_v50 = vmul.f32 0.01, %v34_v44  ;;  %v680_v51 = vpack.c.bf16 %v163_v46, %v162_v45  ;;  %vm58_vm12 = vcmp.gt.f32.partialorder %v42_v42, 0.0  ;;  %v35_v53 = vld [vmem:[#allocation2 + $0x38] sm:$0xff] }
  0x1e   :  { %126 = vxpose.xlu1.b32.cont [3/8] (short) %v86_v19, 128  ;;  %685 = vmatprep.subr.bf16.mxu1 %v672_v34  ;;  %v81_v48 = vsel %vm49_vm11, %v33_v35, %v65_v41  ;;  %vm50_vm13 = vcmp.gt.f32.partialorder %v34_v44, 0.0  ;;  %v90_v54 = vsel %vm58_vm12, %v42_v42, %v74_v49  ;;  %v75_v56 = vmul.f32 0.01, %v43_v52 }
  0x1f   :  { %94 = vxpose.xlu0.b32.cont [3/8] (short) %v78_v20, 128  ;;  %v82_v55 = vsel %vm50_vm13, %v34_v44, %v66_v50  ;;  %v67_v57 = vmul.f32 0.01, %v35_v53  ;;  %vm59_vm14 = vcmp.gt.f32.partialorder %v43_v52, 0.0  ;;  %vm51_vm15 = vcmp.gt.f32.partialorder %v35_v53, 0.0 }
  0x20   :  { %675 = vmatpush3.bf16.msra.mxu0 %v672_v34  ;;  %v91_v58 = vsel %vm59_vm14, %v43_v52, %v75_v56  ;;  %vm171_vm0 = vcmask 523264   ;;  %vm493_vm1 = vcmask 261120  }
  0x21   :  { %689 = vmatpush3.bf16.msra.mxu1 %v672_v34  ;;  %677 = vmatprep.subr.bf16.mxu0 %v676_v43  ;;  %v83_v59 = vsel %vm51_vm15, %v35_v53, %v67_v57 }
  0x22   :  { %127 = vxpose.xlu1.b32.cont [4/8] (short) %v87_v28, 128  ;;  %686 = vmatprep.subr.bf16.mxu1 %v676_v43  ;;  %v815_v28 = vld [vmem:[%s979_s2] ss:$0 sm:$0xff] }
  0x23   :  { %95 = vxpose.xlu0.b32.cont [4/8] (short) %v79_v30, 128 }
  0x24   :  { %679 = vmatpush3.bf16.msra.mxu0 %v676_v43 }
  0x25   :  { %690 = vmatpush3.bf16.msra.mxu1 %v676_v43  ;;  %681 = vmatprep.subr.bf16.mxu0 %v680_v51 }
  0x26   :  { %128 = vxpose.xlu1.b32.cont [5/8] (short) %v88_v39, 128  ;;  %687 = vmatprep.subr.bf16.mxu1 %v680_v51 }
  0x27   :  { %96 = vxpose.xlu0.b32.cont [5/8] (short) %v80_v40, 128 }
  0x28   :  { %683 = vmatpush3.bf16.msra.mxu0 %v680_v51 }
  0x29   :  { %691 = vmatpush3.bf16.msra.mxu1 %v680_v51 }
  0x2a   :  { %129 = vxpose.xlu1.b32.cont [6/8] (short) %v89_v47, 128 }
  0x2b   :  { %97 = vxpose.xlu0.b32.cont [6/8] (short) %v81_v48, 128 }
  0x2e   :  { %130 = vxpose.xlu1.b32.cont [7/8] (short) %v90_v54, 128 }
  0x2f   :  { %98 = vxpose.xlu0.b32.cont [7/8] (short) %v82_v55, 128 }
  0x32   :  { %131 = vxpose.xlu1.b32.end [8/8] (short) %v91_v58, 128 }
  0x33   :  { %99 = vxpose.xlu0.b32.end [8/8] (short) %v83_v59, 128 }
  0x96   :  { %v140_v60 = vpop.trf.xlu1 }
  0x97   :  { %v108_v61 = vpop.trf.xlu0  ;;  %644 = vmatprep.mubr.msk.f32.mxu1 %vm171_vm0, %v140_v60 }
  0x98   :  { %620 = vmatprep.mubr.msk.f32.mxu0 %vm171_vm0, %v108_v61 }
  0x9a   :  { %v141_v62 = vpop.trf.xlu1 }
  0x9b   :  { %v109_v63 = vpop.trf.xlu0  ;;  %645 = vmatmul.mubr.msk.f32.vlgmr.msra.gmra.mrb[0].mxu1 %vm171_vm0, %v141_v62 }
  0x9c   :  { %621 = vmatmul.mubr.msk.f32.vlgmr.msra.gmra.mrb[0].mxu0 %vm171_vm0, %v109_v63 }
  0x9e   :  { %v142_v0 = vpop.trf.xlu1 }
  0x9f   :  { %v110_v1 = vpop.trf.xlu0  ;;  %647 = vmatprep.mubr.msk.f32.mxu1 %vm171_vm0, %v142_v0 }
  0xa0   :  { %623 = vmatprep.mubr.msk.f32.mxu0 %vm171_vm0, %v110_v1 }
  0xa2   :  { %v143_v2 = vpop.trf.xlu1 }
  0xa3   :  { %v111_v3 = vpop.trf.xlu0  ;;  %648 = vmatmul.mubr.msk.f32.gmra.mrb[2].mxu1 %vm171_vm0, %v143_v2 }
  0xa4   :  { %624 = vmatmul.mubr.msk.f32.gmra.mrb[2].mxu0 %vm171_vm0, %v111_v3 }
  0xa6   :  { %v144_v4 = vpop.trf.xlu1 }
  0xa7   :  { %v112_v5 = vpop.trf.xlu0  ;;  %650 = vmatprep.mubr.msk.f32.mxu1 %vm171_vm0, %v144_v4 }
  0xa8   :  { %626 = vmatprep.mubr.msk.f32.mxu0 %vm171_vm0, %v112_v5 }
  0xaa   :  { %v145_v6 = vpop.trf.xlu1 }
  0xab   :  { %v113_v7 = vpop.trf.xlu0  ;;  %651 = vmatmul.mubr.msk.f32.gmra.mrb[4].mxu1 %vm171_vm0, %v145_v6 }
  0xac   :  { %627 = vmatmul.mubr.msk.f32.gmra.mrb[4].mxu0 %vm171_vm0, %v113_v7 }
  0xae   :  { %v146_v8 = vpop.trf.xlu1 }
  0xaf   :  { %v114_v9 = vpop.trf.xlu0  ;;  %653 = vmatprep.mubr.msk.f32.mxu1 %vm171_vm0, %v146_v8 }
  0xb0   :  { %629 = vmatprep.mubr.msk.f32.mxu0 %vm171_vm0, %v114_v9 }
  0xb2   :  { %v147_v10 = vpop.trf.xlu1 }
  0xb3   :  { %v115_v11 = vpop.trf.xlu0  ;;  %654 = vmatmul.mubr.msk.f32.gmra.mrb[6].mxu1 %vm171_vm0, %v147_v10 }
  0xb4   :  { %630 = vmatmul.mubr.msk.f32.gmra.mrb[6].mxu0 %vm171_vm0, %v115_v11 }
  0xb6   :  { %v148_v12 = vpop.trf.xlu1 }
  0xb7   :  { %v116_v13 = vpop.trf.xlu0  ;;  %656 = vmatprep.mubr.msk.f32.mxu1 %vm171_vm0, %v148_v12 }
  0xb8   :  { %632 = vmatprep.mubr.msk.f32.mxu0 %vm171_vm0, %v116_v13 }
  0xba   :  { %v149_v14 = vpop.trf.xlu1 }
  0xbb   :  { %v117_v15 = vpop.trf.xlu0  ;;  %657 = vmatmul.mubr.msk.f32.gmra.mrb[8].mxu1 %vm171_vm0, %v149_v14 }
  0xbc   :  { %633 = vmatmul.mubr.msk.f32.gmra.mrb[8].mxu0 %vm171_vm0, %v117_v15 }
  0xbe   :  { %v150_v16 = vpop.trf.xlu1 }
  0xbf   :  { %v118_v17 = vpop.trf.xlu0  ;;  %659 = vmatprep.mubr.msk.f32.mxu1 %vm171_vm0, %v150_v16 }
  0xc0   :  { %635 = vmatprep.mubr.msk.f32.mxu0 %vm171_vm0, %v118_v17 }
  0xc2   :  { %v151_v18 = vpop.trf.xlu1 }
  0xc3   :  { %v119_v19 = vpop.trf.xlu0  ;;  %660 = vmatmul.mubr.msk.f32.gmra.mrb[10].mxu1 %vm171_vm0, %v151_v18 }
  0xc4   :  { %636 = vmatmul.mubr.msk.f32.gmra.mrb[10].mxu0 %vm171_vm0, %v119_v19 }
  0xc6   :  { %v152_v20 = vpop.trf.xlu1 }
  0xc7   :  { %v120_v21 = vpop.trf.xlu0  ;;  %662 = vmatprep.mubr.msk.f32.mxu1 %vm171_vm0, %v152_v20 }
  0xc8   :  { %638 = vmatprep.mubr.msk.f32.mxu0 %vm171_vm0, %v120_v21 }
  0xca   :  { %v153_v22 = vpop.trf.xlu1 }
  0xcb   :  { %v121_v23 = vpop.trf.xlu0  ;;  %663 = vmatmul.mubr.msk.f32.gmra.mrb[12].mxu1 %vm171_vm0, %v153_v22 }
  0xcc   :  { %639 = vmatmul.mubr.msk.f32.gmra.mrb[12].mxu0 %vm171_vm0, %v121_v23 }
  0xce   :  { %v154_v24 = vpop.trf.xlu1 }
  0xcf   :  { %v122_v25 = vpop.trf.xlu0  ;;  %665 = vmatprep.mubr.msk.f32.mxu1 %vm171_vm0, %v154_v24 }
  0xd0   :  { %641 = vmatprep.mubr.msk.f32.mxu0 %vm171_vm0, %v122_v25 }
  0xd2   :  { %v155_v26 = vpop.trf.xlu1 }
  0xd3   :  { %v123_v27 = vpop.trf.xlu0  ;;  %666 = vmatmul.mubr.msk.f32.gmra.mrb[14].mxu1 %vm171_vm0, %v155_v26 }
  0xd4   :  { %642 = vmatmul.mubr.msk.f32.gmra.mrb[14].mxu0 %vm171_vm0, %v123_v27 }
 0x16e   :  { %v646_v30 = vpop.f32.mrb[0].mxu1 }
 0x16f   :  { %v622_v29 = vpop.f32.mrb[0].mxu0  ;;  %v420_v32 = vadd.f32 %v646_v30, %v815_v28  ;;  %v414_v34 = vpop.f32.mrb[1].mxu1 }
 0x170   :  { %v340_v31 = vadd.f32 %v622_v29, %v815_v28  ;;  %v334_v33 = vpop.f32.mrb[1].mxu0  ;;  %v415_v36 = vadd.f32 %v815_v28, %v414_v34 }
 0x171   :  { %v335_v35 = vadd.f32 %v815_v28, %v334_v33  ;;  %511 = vst.msk [vmem:[%s980_s3 + $0x88] sm:$0xff] %vm493_vm1, %v420_v32 }
 0x172   :  { %495 = vst.msk [vmem:[%s980_s3 + $0x8] sm:$0xff] %vm493_vm1, %v340_v31  ;;  %510 = vst.msk [vmem:[%s980_s3 + $0x80] sm:$0xff] %vm493_vm1, %v415_v36 }
 0x173   :  { %494 = vst.msk [vmem:[%s980_s3] sm:$0xff] %vm493_vm1, %v335_v35 }
 0x176   :  { %v649_v38 = vpop.f32.mrb[2].mxu1 }
 0x177   :  { %v625_v37 = vpop.f32.mrb[2].mxu0  ;;  %v430_v40 = vadd.f32 %v649_v38, %v815_v28  ;;  %v424_v42 = vpop.f32.mrb[3].mxu1 }
 0x178   :  { %v350_v39 = vadd.f32 %v625_v37, %v815_v28  ;;  %v344_v41 = vpop.f32.mrb[3].mxu0  ;;  %v425_v44 = vadd.f32 %v815_v28, %v424_v42 }
 0x179   :  { %v345_v43 = vadd.f32 %v815_v28, %v344_v41  ;;  %513 = vst.msk [vmem:[%s980_s3 + $0x98] sm:$0xff] %vm493_vm1, %v430_v40 }
 0x17a   :  { %497 = vst.msk [vmem:[%s980_s3 + $0x18] sm:$0xff] %vm493_vm1, %v350_v39  ;;  %512 = vst.msk [vmem:[%s980_s3 + $0x90] sm:$0xff] %vm493_vm1, %v425_v44 }
 0x17b   :  { %496 = vst.msk [vmem:[%s980_s3 + $0x10] sm:$0xff] %vm493_vm1, %v345_v43 }
 0x17e   :  { %v652_v46 = vpop.f32.mrb[4].mxu1 }
 0x17f   :  { %v628_v45 = vpop.f32.mrb[4].mxu0  ;;  %v440_v48 = vadd.f32 %v652_v46, %v815_v28  ;;  %v434_v50 = vpop.f32.mrb[5].mxu1 }
 0x180   :  { %v360_v47 = vadd.f32 %v628_v45, %v815_v28  ;;  %v354_v49 = vpop.f32.mrb[5].mxu0  ;;  %v435_v52 = vadd.f32 %v815_v28, %v434_v50 }
 0x181   :  { %v355_v51 = vadd.f32 %v815_v28, %v354_v49  ;;  %515 = vst.msk [vmem:[%s980_s3 + $0xa8] sm:$0xff] %vm493_vm1, %v440_v48 }
 0x182   :  { %499 = vst.msk [vmem:[%s980_s3 + $0x28] sm:$0xff] %vm493_vm1, %v360_v47  ;;  %514 = vst.msk [vmem:[%s980_s3 + $0xa0] sm:$0xff] %vm493_vm1, %v435_v52 }
 0x183   :  { %498 = vst.msk [vmem:[%s980_s3 + $0x20] sm:$0xff] %vm493_vm1, %v355_v51 }
 0x186   :  { %v655_v54 = vpop.f32.mrb[6].mxu1 }
 0x187   :  { %v631_v53 = vpop.f32.mrb[6].mxu0  ;;  %v450_v56 = vadd.f32 %v655_v54, %v815_v28  ;;  %v444_v58 = vpop.f32.mrb[7].mxu1 }
 0x188   :  { %v370_v55 = vadd.f32 %v631_v53, %v815_v28  ;;  %v364_v57 = vpop.f32.mrb[7].mxu0  ;;  %v445_v60 = vadd.f32 %v815_v28, %v444_v58 }
 0x189   :  { %v365_v59 = vadd.f32 %v815_v28, %v364_v57  ;;  %517 = vst.msk [vmem:[%s980_s3 + $0xb8] sm:$0xff] %vm493_vm1, %v450_v56 }
 0x18a   :  { %501 = vst.msk [vmem:[%s980_s3 + $0x38] sm:$0xff] %vm493_vm1, %v370_v55  ;;  %516 = vst.msk [vmem:[%s980_s3 + $0xb0] sm:$0xff] %vm493_vm1, %v445_v60 }
 0x18b   :  { %500 = vst.msk [vmem:[%s980_s3 + $0x30] sm:$0xff] %vm493_vm1, %v365_v59 }
 0x18e   :  { %v658_v62 = vpop.f32.mrb[8].mxu1 }
 0x18f   :  { %v634_v61 = vpop.f32.mrb[8].mxu0  ;;  %v460_v0 = vadd.f32 %v658_v62, %v815_v28  ;;  %v454_v2 = vpop.f32.mrb[9].mxu1 }
 0x190   :  { %v380_v63 = vadd.f32 %v634_v61, %v815_v28  ;;  %v374_v1 = vpop.f32.mrb[9].mxu0  ;;  %v455_v4 = vadd.f32 %v815_v28, %v454_v2 }
 0x191   :  { %v375_v3 = vadd.f32 %v815_v28, %v374_v1  ;;  %519 = vst.msk [vmem:[%s980_s3 + $0xc8] sm:$0xff] %vm493_vm1, %v460_v0 }
 0x192   :  { %503 = vst.msk [vmem:[%s980_s3 + $0x48] sm:$0xff] %vm493_vm1, %v380_v63  ;;  %518 = vst.msk [vmem:[%s980_s3 + $0xc0] sm:$0xff] %vm493_vm1, %v455_v4 }
 0x193   :  { %502 = vst.msk [vmem:[%s980_s3 + $0x40] sm:$0xff] %vm493_vm1, %v375_v3 }
 0x196   :  { %v661_v6 = vpop.f32.mrb[10].mxu1 }
 0x197   :  { %v637_v5 = vpop.f32.mrb[10].mxu0  ;;  %v470_v8 = vadd.f32 %v661_v6, %v815_v28  ;;  %v464_v10 = vpop.f32.mrb[11].mxu1 }
 0x198   :  { %v390_v7 = vadd.f32 %v637_v5, %v815_v28  ;;  %v384_v9 = vpop.f32.mrb[11].mxu0  ;;  %v465_v12 = vadd.f32 %v815_v28, %v464_v10 }
 0x199   :  { %v385_v11 = vadd.f32 %v815_v28, %v384_v9  ;;  %521 = vst.msk [vmem:[%s980_s3 + $0xd8] sm:$0xff] %vm493_vm1, %v470_v8 }
 0x19a   :  { %505 = vst.msk [vmem:[%s980_s3 + $0x58] sm:$0xff] %vm493_vm1, %v390_v7  ;;  %520 = vst.msk [vmem:[%s980_s3 + $0xd0] sm:$0xff] %vm493_vm1, %v465_v12 }
 0x19b   :  { %504 = vst.msk [vmem:[%s980_s3 + $0x50] sm:$0xff] %vm493_vm1, %v385_v11 }
 0x19e   :  { %v664_v14 = vpop.f32.mrb[12].mxu1 }
 0x19f   :  { %v640_v13 = vpop.f32.mrb[12].mxu0  ;;  %v480_v16 = vadd.f32 %v664_v14, %v815_v28  ;;  %v474_v18 = vpop.f32.mrb[13].mxu1 }
 0x1a0   :  { %v400_v15 = vadd.f32 %v640_v13, %v815_v28  ;;  %v394_v17 = vpop.f32.mrb[13].mxu0  ;;  %v475_v20 = vadd.f32 %v815_v28, %v474_v18 }
 0x1a1   :  { %v395_v19 = vadd.f32 %v815_v28, %v394_v17  ;;  %523 = vst.msk [vmem:[%s980_s3 + $0xe8] sm:$0xff] %vm493_vm1, %v480_v16 }
 0x1a2   :  { %507 = vst.msk [vmem:[%s980_s3 + $0x68] sm:$0xff] %vm493_vm1, %v400_v15  ;;  %522 = vst.msk [vmem:[%s980_s3 + $0xe0] sm:$0xff] %vm493_vm1, %v475_v20 }
 0x1a3   :  { %506 = vst.msk [vmem:[%s980_s3 + $0x60] sm:$0xff] %vm493_vm1, %v395_v19 }
 0x1a6   :  { %v667_v22 = vpop.f32.mrb[14].mxu1 }
 0x1a7   :  { %v643_v21 = vpop.f32.mrb[14].mxu0  ;;  %v490_v24 = vadd.f32 %v667_v22, %v815_v28  ;;  %v484_v26 = vpop.f32.mrb[15].mxu1 }
 0x1a8   :  { %v410_v23 = vadd.f32 %v643_v21, %v815_v28  ;;  %v404_v25 = vpop.f32.mrb[15].mxu0  ;;  %v485_v29 = vadd.f32 %v815_v28, %v484_v26 }
 0x1a9   :  { %v405_v27 = vadd.f32 %v815_v28, %v404_v25  ;;  %525 = vst.msk [vmem:[%s980_s3 + $0xf8] sm:$0xff] %vm493_vm1, %v490_v24 }
 0x1aa   :  { %509 = vst.msk [vmem:[%s980_s3 + $0x78] sm:$0xff] %vm493_vm1, %v410_v23  ;;  %524 = vst.msk [vmem:[%s980_s3 + $0xf0] sm:$0xff] %vm493_vm1, %v485_v29 }
 0x1ab   :  { %508 = vst.msk [vmem:[%s980_s3 + $0x70] sm:$0xff] %vm493_vm1, %v405_v27 }
 0x1ac   :  { %530 = vsyncpa [#allocation3], 1 }

</bundles_post_ra>
